<compile_context>
chip_gen: v6e
topology: v6e:2x2x1
jax: 0.10.0
libtpu: 0.0.40
codegen_flags: <defaults>
</compile_context>

<pallas_src>
import functools
import math

import jax
import jax.numpy as jnp
from jax.experimental import pallas as pl
from jax.experimental.pallas import tpu as pltpu

TM = 512          # rows per M tile (matmul kernels)
TK = 512          # K tile (reduction) for the K-tiled matmul path


def _cdiv(a, b):
    return -(-a // b)


def _round_up(a, m):
    return _cdiv(a, m) * m


def _vmem_limit_bytes():
    # ~3/4 of physical VMEM, capped: ~96 MiB on v5e/v6e (128 MiB), ~48 MiB on v7x (64 MiB).
    try:
        cap = pltpu.get_tpu_info().vmem_capacity_bytes
        return int(min(cap * 3 // 4, 96 * 1024 * 1024))
    except Exception:
        return 48 * 1024 * 1024


_VMEM_LIMIT = _vmem_limit_bytes()


def _mtile(M, min_tiles=2):
    # pick an M tiling with at least `min_tiles` grid steps (feeds both v7x TCs)
    Mp = _round_up(M, 8)
    ntiles = max(min_tiles, _cdiv(Mp, TM)) if Mp >= 16 else 1
    tm = min(TM, _round_up(_cdiv(Mp, ntiles), 8))
    Mp = _round_up(Mp, tm)
    return tm, Mp


def _act(y, act):
    if act is None:
        return y
    if act == "relu":
        return jnp.maximum(y, 0.0)
    if act == "silu":
        return y * jax.nn.sigmoid(y)
    if act == "gelu":
        return 0.5 * y * (1.0 + jax.lax.erf(y * (1.0 / math.sqrt(2.0))))
    raise ValueError(f"unknown act {act}")


def _ln(y, g, b, eps=1e-5):
    mu = jnp.mean(y, axis=-1, keepdims=True)
    var = jnp.mean((y - mu) ** 2, axis=-1, keepdims=True)
    return (y - mu) * jax.lax.rsqrt(var + eps) * g + b


def _full_spec(shape):
    n = len(shape)
    return pl.BlockSpec(shape, lambda *args: (0,) * n)


# ----------------------------------------------------------------------------
# Kernel 1: tiled matmul + bias + act  (single-K-step fast path, no scratch)
# ----------------------------------------------------------------------------
def _mm1_kernel(x_ref, w_ref, b_ref, o_ref, *, act):
    y = jnp.dot(x_ref[...].astype(jnp.bfloat16), w_ref[...],
                preferred_element_type=jnp.float32) + b_ref[...].astype(jnp.float32)
    o_ref[...] = _act(y, act).astype(o_ref.dtype)


def _mmk_kernel(x_ref, w_ref, b_ref, o_ref, acc_ref, *, act, nk):
    @pl.when(pl.program_id(1) == 0)
    def _():
        acc_ref[...] = jnp.zeros_like(acc_ref)

    acc_ref[...] += jnp.dot(x_ref[...].astype(jnp.bfloat16), w_ref[...],
                            preferred_element_type=jnp.float32)

    @pl.when(pl.program_id(1) == nk - 1)
    def _():
        y = acc_ref[...] + b_ref[...].astype(jnp.float32)
        o_ref[...] = _act(y, act).astype(o_ref.dtype)


def fused_matmul(x, w, b, act=None, out_dtype=jnp.bfloat16):
    M, K = x.shape
    N = w.shape[1]
    tm, Mp = _mtile(M)
    if Mp != M:
        x = jnp.pad(x, ((0, Mp - M), (0, 0)))
    gm = Mp // tm

    if K <= TK:   # single K step: no accumulator scratch, no pl.when
        out = pl.pallas_call(
            functools.partial(_mm1_kernel, act=act),
            grid=(gm,),
            in_specs=[pl.BlockSpec((tm, K), lambda i: (i, 0)),
                      _full_spec(w.shape), _full_spec(b.shape)],
            out_specs=pl.BlockSpec((tm, N), lambda i: (i, 0)),
            out_shape=jax.ShapeDtypeStruct((Mp, N), out_dtype),
            compiler_params=pltpu.CompilerParams(
                dimension_semantics=("parallel",),
                vmem_limit_bytes=_VMEM_LIMIT),
        )(x, w, b)
    else:
        Kp = _round_up(K, TK)
        if Kp != K:
            x = jnp.pad(x, ((0, 0), (0, Kp - K)))
            w = jnp.pad(w, ((0, Kp - K), (0, 0)))
        nk = Kp // TK
        out = pl.pallas_call(
            functools.partial(_mmk_kernel, act=act, nk=nk),
            grid=(gm, nk),
            in_specs=[pl.BlockSpec((tm, TK), lambda i, k: (i, k)),
                      pl.BlockSpec((TK, N), lambda i, k: (k, 0)),
                      pl.BlockSpec((1, N), lambda i, k: (0, 0))],
            out_specs=pl.BlockSpec((tm, N), lambda i, k: (i, 0)),
            out_shape=jax.ShapeDtypeStruct((Mp, N), out_dtype),
            scratch_shapes=[pltpu.VMEM((tm, N), jnp.float32)],
            compiler_params=pltpu.CompilerParams(
                dimension_semantics=("parallel", "arbitrary"),
                vmem_limit_bytes=_VMEM_LIMIT),
        )(x, w, b)

    if Mp != M:
        out = out[:M]
    return out


def conv1x1(x_nhwc, w, b, act=None, out_dtype=jnp.bfloat16):
    B, H, W, C = x_nhwc.shape
    y = fused_matmul(x_nhwc.reshape(B * H * W, C), w, b, act=act, out_dtype=out_dtype)
    return y.reshape(B, H, W, -1)


# ----------------------------------------------------------------------------
# Kernel 2: fully fused transformer encoder layer (AIFI), gridded over batch.
#   qk/v projection (pos-add fused) + per-head attention + out-proj + residual
#   + LN1 + FFN + residual + LN2, all in one kernel invocation per image.
# ----------------------------------------------------------------------------
def _enc_layer_kernel(src_ref, pos_ref, wqk_ref, bqk_ref, wv_ref, bv_ref,
                      wo_ref, bo_ref, w1_ref, b1_ref, w2_ref, b2_ref,
                      g1_ref, be1_ref, g2_ref, be2_ref, o_ref,
                      *, nhead, enc_act):
    x = src_ref[0].astype(jnp.float32)                        # (S, E) residual stream (f32)
    S, E = x.shape
    dh = E // nhead
    scale = 1.0 / math.sqrt(dh)

    xp = (x + pos_ref[...].astype(jnp.float32)).astype(jnp.bfloat16)
    qk = jnp.dot(xp, wqk_ref[...], preferred_element_type=jnp.float32) + bqk_ref[...]
    v = jnp.dot(x.astype(jnp.bfloat16), wv_ref[...],
                preferred_element_type=jnp.float32) + bv_ref[...]

    # TODO(synk): head-major (nhead, S, dh) layout / batched dot_general would
    # avoid the dh-wide lane slices; kept simple since S and dh are tiny here.
    heads = []
    for h in range(nhead):
        q = (qk[:, h * dh:(h + 1) * dh] * scale).astype(jnp.bfloat16)
        k = qk[:, E + h * dh:E + (h + 1) * dh].astype(jnp.bfloat16)
        vh = v[:, h * dh:(h + 1) * dh].astype(jnp.bfloat16)
        s = jax.lax.dot_general(q, k, (((1,), (1,)), ((), ())),
                                preferred_element_type=jnp.float32)
        m = jnp.max(s, axis=-1, keepdims=True)
        e = jnp.exp(s - m)
        p = e * pl.reciprocal(jnp.sum(e, axis=-1, keepdims=True), approx=True)
        heads.append(jnp.dot(p.astype(jnp.bfloat16), vh,
                             preferred_element_type=jnp.float32))
    attn = jnp.concatenate(heads, axis=-1)                    # (S, E)

    y = jnp.dot(attn.astype(jnp.bfloat16), wo_ref[...],
                preferred_element_type=jnp.float32) + bo_ref[...]
    y = _ln(y + x, g1_ref[...], be1_ref[...])                 # post-norm 1

    h1 = _act(jnp.dot(y.astype(jnp.bfloat16), w1_ref[...],
                      preferred_element_type=jnp.float32) + b1_ref[...], enc_act)
    y2 = jnp.dot(h1.astype(jnp.bfloat16), w2_ref[...],
                 preferred_element_type=jnp.float32) + b2_ref[...]
    y2 = _ln(y2 + y, g2_ref[...], be2_ref[...])               # post-norm 2
    o_ref[0] = y2.astype(o_ref.dtype)


def transformer_encoder_layer(p, src_bse, pos_se, nhead, enc_act="gelu"):
    B, S, E = src_bse.shape
    w_args = [p["wqk"], p["bqk"], p["wv"], p["bv"], p["wo"], p["bo"],
              p["w1"], p["b1"], p["w2"], p["b2"],
              p["ln1_g"], p["ln1_b"], p["ln2_g"], p["ln2_b"]]
    in_specs = [pl.BlockSpec((1, S, E), lambda b: (b, 0, 0)),
                _full_spec(pos_se.shape)] + [_full_spec(a.shape) for a in w_args]
    return pl.pallas_call(
        functools.partial(_enc_layer_kernel, nhead=nhead, enc_act=enc_act),
        grid=(B,),
        in_specs=in_specs,
        out_specs=pl.BlockSpec((1, S, E), lambda b: (b, 0, 0)),
        out_shape=jax.ShapeDtypeStruct((B, S, E), jnp.float32),
        compiler_params=pltpu.CompilerParams(
            dimension_semantics=("parallel",),
            vmem_limit_bytes=_VMEM_LIMIT),
    )(src_bse, pos_se, *w_args)


# ----------------------------------------------------------------------------
# Kernel 3: fully fused CSPRepLayer, gridded over batch.
#   conv1/conv2 over concat([a, b]) (never materialized) + nb RepVGG-folded 3x3
#   blocks + final add, all resident in VMEM for the current image.
#   The 3x3 convs use a (HW + 2*(W+1), C) zero-guarded slab; column wrap is
#   killed by per-position masks; each block is one K=9*C matmul.
# ----------------------------------------------------------------------------
def _csp_layer_kernel(a_ref, b_ref, w1a_ref, w1b_ref, b1_ref,
                      w2a_ref, w2b_ref, b2_ref, wst_ref, bst_ref,
                      m0_ref, m2_ref, o_ref, *, W, nb, act):
    HW = a_ref.shape[1]
    C = wst_ref.shape[2]
    a = a_ref[0].astype(jnp.bfloat16)
    bb = b_ref[0].astype(jnp.bfloat16)

    x1 = _act(jnp.dot(a, w1a_ref[...], preferred_element_type=jnp.float32)
              + jnp.dot(bb, w1b_ref[...], preferred_element_type=jnp.float32)
              + b1_ref[...], act)
    x2 = _act(jnp.dot(a, w2a_ref[...], preferred_element_type=jnp.float32)
              + jnp.dot(bb, w2b_ref[...], preferred_element_type=jnp.float32)
              + b2_ref[...], act)

    g = W + 1
    zeros = jnp.zeros((g, C), jnp.float32)
    m0 = m0_ref[...]      # (HW,1): left-neighbor validity (dx == 0 taps)
    m2 = m2_ref[...]      # (HW,1): right-neighbor validity (dx == 2 taps)

    y = x1
    for i in range(nb):
        slab = jnp.concatenate([zeros, y, zeros], axis=0)     # per-image zero guard
        taps = []
        for t in range(9):
            dy, dx = divmod(t, 3)
            off = g + (dy - 1) * W + (dx - 1)
            v = slab[off:off + HW]
            if dx == 0:
                v = v * m0
            elif dx == 2:
                v = v * m2
            taps.append(v)
        tap_mat = jnp.concatenate(taps, axis=-1).astype(jnp.bfloat16)   # (HW, 9C)
        y = _act(jnp.dot(tap_mat, wst_ref[i],
                         preferred_element_type=jnp.float32) + bst_ref[i], act)

    o_ref[0] = (y + x2).astype(o_ref.dtype)


def csp_rep_layer(p, a_nhwc, b_nhwc, act="silu", out_dtype=jnp.bfloat16):
    # TODO(synk): for large feature maps (real RT-DETR 80x80x256), row-tile the
    # slab with a 1-row halo instead of keeping the whole image in VMEM.
    B, H, W, C = a_nhwc.shape
    HW = H * W
    hidden = p["w1a"].shape[1]
    nb = p["wst"].shape[0]

    w_idx = jnp.arange(HW, dtype=jnp.int32) % W
    m0 = (w_idx != 0).astype(jnp.float32).reshape(HW, 1)
    m2 = (w_idx != W - 1).astype(jnp.float32).reshape(HW, 1)

    a3 = a_nhwc.reshape(B, HW, C)
    b3 = b_nhwc.reshape(B, HW, C)
    args = [a3, b3, p["w1a"], p["w1b"], p["b1"], p["w2a"], p["w2b"], p["b2"],
            p["wst"], p["bst"], m0, m2]
    in_specs = ([pl.BlockSpec((1, HW, C), lambda b: (b, 0, 0)),
                 pl.BlockSpec((1, HW, C), lambda b: (b, 0, 0))]
                + [_full_spec(x.shape) for x in args[2:]])

    out = pl.pallas_call(
        functools.partial(_csp_layer_kernel, W=W, nb=nb, act=act),
        grid=(B,),
        in_specs=in_specs,
        out_specs=pl.BlockSpec((1, HW, hidden), lambda b: (b, 0, 0)),
        out_shape=jax.ShapeDtypeStruct((B, HW, hidden), out_dtype),
        compiler_params=pltpu.CompilerParams(
            dimension_semantics=("parallel",),
            vmem_limit_bytes=_VMEM_LIMIT),
    )(*args)
    return out.reshape(B, H, W, hidden)   # conv3 is Identity (expansion=1)


# stride-2 3x3 conv (downsample): im2col at output resolution then fused matmul.
# TODO(synk): move the stride-2 tap extraction into the kernel (phase-decomposed)
# to avoid the HBM im2col round trip.
def conv3x3_s2(x_nhwc, w_mat, b, act, out_dtype=jnp.bfloat16):
    B, H, W, C = x_nhwc.shape
    xp = jnp.pad(x_nhwc, ((0, 0), (1, 1), (1, 1), (0, 0)))
    Ho = (H - 1) // 2 + 1
    Wo = (W - 1) // 2 + 1
    cols = [xp[:, dy:dy + 2 * (Ho - 1) + 1:2, dx:dx + 2 * (Wo - 1) + 1:2, :]
            for dy in range(3) for dx in range(3)]
    patches = jnp.concatenate(cols, axis=-1).reshape(B * Ho * Wo, 9 * C)
    y = fused_matmul(patches, w_mat, b, act=act, out_dtype=out_dtype)
    return y.reshape(B, Ho, Wo, -1)


# ----------------------------------------------------------------------------
# Parameters (deterministic, BN folded, weights stored bf16)
# ----------------------------------------------------------------------------
class KeyGen:
    def __init__(self, key):
        self.key = key

    def __call__(self):
        self.key, sub = jax.random.split(self.key)
        return sub


def _conv_w_to_mat(w):  # (Cout, Cin, KH, KW) -> (KH*KW*Cin, Cout)
    return jnp.transpose(w, (2, 3, 1, 0)).reshape(-1, w.shape[0])


def convnorm_params(kg, cin, cout, k):
    w = jax.random.normal(kg(), (cout, cin, k, k), jnp.float32) / math.sqrt(cin * k * k)
    gamma = 1.0 + 0.1 * jax.random.normal(kg(), (cout,), jnp.float32)
    beta = 0.1 * jax.random.normal(kg(), (cout,), jnp.float32)
    mean = 0.1 * jax.random.normal(kg(), (cout,), jnp.float32)
    var = jnp.abs(1.0 + 0.1 * jax.random.normal(kg(), (cout,), jnp.float32))
    scale = gamma / jnp.sqrt(var + 1e-5)
    w_f = w * scale[:, None, None, None]
    b_f = beta - mean * scale
    return {"w": _conv_w_to_mat(w_f).astype(jnp.bfloat16), "b": b_f.reshape(1, -1)}


def linear_params(kg, cin, cout):
    w = jax.random.normal(kg(), (cin, cout), jnp.float32) / math.sqrt(cin)
    b = 0.02 * jax.random.normal(kg(), (1, cout), jnp.float32)
    return w, b


def repvgg_params(kg, ch):
    # fold the 1x1 branch into the 3x3 center tap (deploy-equivalent)
    c3 = convnorm_params(kg, ch, ch, 3)
    c1 = convnorm_params(kg, ch, ch, 1)
    w = c3["w"].astype(jnp.float32)
    w = w.at[4 * ch:5 * ch, :].add(c1["w"].astype(jnp.float32))
    return {"w": w.astype(jnp.bfloat16), "b": c3["b"] + c1["b"]}


def csp_params(kg, cin, hidden, nblocks):
    c1 = convnorm_params(kg, cin, hidden, 1)
    c2 = convnorm_params(kg, cin, hidden, 1)
    blocks = [repvgg_params(kg, hidden) for _ in range(nblocks)]
    return {
        "w1a": c1["w"][:hidden], "w1b": c1["w"][hidden:], "b1": c1["b"],
        "w2a": c2["w"][:hidden], "w2b": c2["w"][hidden:], "b2": c2["b"],
        "wst": jnp.stack([bp["w"] for bp in blocks]),      # (nb, 9*hidden, hidden) bf16
        "bst": jnp.stack([bp["b"] for bp in blocks]),      # (nb, 1, hidden) f32
    }


def encoder_layer_params(kg, E, F):
    wq, bq = linear_params(kg, E, E)
    wk, bk = linear_params(kg, E, E)
    wv, bv = linear_params(kg, E, E)
    wo, bo = linear_params(kg, E, E)
    w1, b1 = linear_params(kg, E, F)
    w2, b2 = linear_params(kg, F, E)
    return {
        "wqk": jnp.concatenate([wq, wk], axis=1).astype(jnp.bfloat16),
        "bqk": jnp.concatenate([bq, bk], axis=1),
        "wv": wv.astype(jnp.bfloat16), "bv": bv,
        "wo": wo.astype(jnp.bfloat16), "bo": bo,
        "w1": w1.astype(jnp.bfloat16), "b1": b1,
        "w2": w2.astype(jnp.bfloat16), "b2": b2,
        "ln1_g": jnp.ones((1, E), jnp.float32), "ln1_b": jnp.zeros((1, E), jnp.float32),
        "ln2_g": jnp.ones((1, E), jnp.float32), "ln2_b": jnp.zeros((1, E), jnp.float32),
    }


def make_params(key, cfg):
    kg = KeyGen(key)
    hidden, dimff = cfg["hidden_dim"], cfg["dim_feedforward"]
    nlev = len(cfg["in_channels"])
    params = {}
    params["input_proj"] = [convnorm_params(kg, cin, hidden, 1) for cin in cfg["in_channels"]]
    params["encoder"] = [
        [encoder_layer_params(kg, hidden, dimff) for _ in range(cfg["num_encoder_layers"])]
        for _ in cfg["use_encoder_idx"]
    ]
    nb = round(3 * cfg["depth_mult"])
    params["lateral_convs"] = [convnorm_params(kg, hidden, hidden, 1) for _ in range(nlev - 1)]
    params["fpn_blocks"] = [csp_params(kg, 2 * hidden, hidden, nb) for _ in range(nlev - 1)]
    params["downsample_convs"] = [convnorm_params(kg, hidden, hidden, 3) for _ in range(nlev - 1)]
    params["pan_blocks"] = [csp_params(kg, 2 * hidden, hidden, nb) for _ in range(nlev - 1)]
    return params


# ----------------------------------------------------------------------------
# Positional embedding (identical to the torch builder)
# ----------------------------------------------------------------------------
def build_2d_sincos_position_embedding(w, h, embed_dim, temperature):
    grid_w = jnp.arange(int(w), dtype=jnp.float32)
    grid_h = jnp.arange(int(h), dtype=jnp.float32)
    grid_w, grid_h = jnp.meshgrid(grid_w, grid_h, indexing="ij")
    assert embed_dim % 4 == 0
    pos_dim = embed_dim // 4
    omega = jnp.arange(pos_dim, dtype=jnp.float32) / pos_dim
    omega = 1.0 / (temperature ** omega)
    out_w = grid_w.flatten()[:, None] @ omega[None]
    out_h = grid_h.flatten()[:, None] @ omega[None]
    return jnp.concatenate(
        [jnp.sin(out_w), jnp.cos(out_w), jnp.sin(out_h), jnp.cos(out_h)], axis=1)[None]


# ----------------------------------------------------------------------------
# HybridEncoder forward
# ----------------------------------------------------------------------------
def hybrid_encoder_forward(params, feats_nchw, cfg):
    # TODO(synk): heatmap drawing (cv2), training-mode dropout and the
    # config.new_encoder EnCover branch are not translated (eval path only).
    hidden = cfg["hidden_dim"]
    nhead = cfg["nhead"]
    nlev = len(cfg["in_channels"])
    act = cfg["act"]

    feats = [jnp.transpose(f, (0, 2, 3, 1)) for f in feats_nchw]   # NCHW -> NHWC

    proj = []
    for i, f in enumerate(feats):
        odt = jnp.float32 if i in cfg["use_encoder_idx"] else jnp.bfloat16
        proj.append(conv1x1(f, params["input_proj"][i]["w"],
                            params["input_proj"][i]["b"], act=None, out_dtype=odt))

    # AIFI (one fused pallas_call per layer, gridded over batch)
    if cfg["num_encoder_layers"] > 0:
        for i, enc_ind in enumerate(cfg["use_encoder_idx"]):
            x = proj[enc_ind]
            B, H, W, C = x.shape
            S = H * W
            src = x.reshape(B, S, C)
            pos = build_2d_sincos_position_embedding(W, H, hidden, cfg["pe_temperature"])[0]
            for lp in params["encoder"][i]:
                src = transformer_encoder_layer(lp, src, pos, nhead, enc_act=cfg["enc_act"])
            proj[enc_ind] = src.reshape(B, H, W, C)

    # CCFM top-down (FPN)
    inner = [proj[-1]]
    for idx in range(nlev - 1, 0, -1):
        li = nlev - 1 - idx
        feat_high = inner[0]
        feat_low = proj[idx - 1]
        feat_high = conv1x1(feat_high, params["lateral_convs"][li]["w"],
                            params["lateral_convs"][li]["b"], act=act)
        inner[0] = feat_high
        # TODO(synk): fold the 2x nearest upsample into the CSP entry read path
        # (index-mapped duplication) instead of materializing the repeat in HBM.
        up = jnp.repeat(jnp.repeat(feat_high, 2, axis=1), 2, axis=2)
        inner_out = csp_rep_layer(params["fpn_blocks"][li], up, feat_low, act=act)
        inner.insert(0, inner_out)

    # CCFM bottom-up (PAN)
    outs = [inner[0]]
    for idx in range(nlev - 1):
        feat_low = outs[-1]
        feat_high = inner[idx + 1]
        down = conv3x3_s2(feat_low, params["downsample_convs"][idx]["w"],
                          params["downsample_convs"][idx]["b"], act=act)
        out = csp_rep_layer(params["pan_blocks"][idx], down, feat_high, act=act)
        outs.append(out)

    return [jnp.transpose(o, (0, 3, 1, 2)).astype(jnp.float32) for o in outs]   # NHWC -> NCHW


# ----------------------------------------------------------------------------
# main
# ----------------------------------------------------------------------------
if __name__ == "__main__":
    cfg = dict(
        in_channels=[16, 32, 64],
        feat_strides=[8, 16, 32],
        hidden_dim=32,
        nhead=4,
        dim_feedforward=64,
        enc_act="gelu",
        use_encoder_idx=[2],
        num_encoder_layers=1,
        pe_temperature=10000.0,
        expansion=1.0,
        depth_mult=1.0,
        act="silu",
    )

    key = jax.random.PRNGKey(0)
    kp, k0, k1, k2 = jax.random.split(key, 4)
    params = make_params(kp, cfg)

    B = 2
    feats = [
        jax.random.normal(k0, (B, 16, 8, 8), jnp.float32),   # stride-8 level
        jax.random.normal(k1, (B, 32, 4, 4), jnp.float32),   # stride-16 level
        jax.random.normal(k2, (B, 64, 2, 2), jnp.float32),   # stride-32 level
    ]

    outs = hybrid_encoder_forward(params, feats, cfg)
    outs = [jax.block_until_ready(o) for o in outs]

    expected = [(B, 32, 8, 8), (B, 32, 4, 4), (B, 32, 2, 2)]
    assert [tuple(o.shape) for o in outs] == expected, [o.shape for o in outs]
    assert all(bool(jnp.all(jnp.isfinite(o))) for o in outs)
    print("KERNEL_OK")
</pallas_src>

<mosaic_0001>
module attributes {stable_mosaic.version = 11 : i64} {
  func.func @_mm1_kernel(%arg0: i32, %arg1: memref<64x16xf32, #tpu.memory_space<vmem>>, %arg2: memref<16x32xbf16, #tpu.memory_space<vmem>>, %arg3: memref<1x32xf32, #tpu.memory_space<vmem>>, %arg4: memref<64x32xbf16, #tpu.memory_space<vmem>>) attributes {dimension_semantics = [#tpu.dimension_semantics<parallel>], iteration_bounds = array<i64: 2>, scalar_prefetch = 0 : i64, scratch_operands = 0 : i64, tpu.core_type = #tpu.core_type<tc>, window_params = [{transform_indices = @transform_0, window_bounds = array<i64: 64, 16>}, {pipeline_mode = #tpu.pipeline_mode<synchronous>, transform_indices = @transform_1, window_bounds = array<i64: 16, 32>}, {pipeline_mode = #tpu.pipeline_mode<synchronous>, transform_indices = @transform_2, window_bounds = array<i64: 1, 32>}, {transform_indices = @transform_3, window_bounds = array<i64: 64, 32>}]} {
    %c0 = arith.constant 0 : index
    %c0_0 = arith.constant 0 : index
    %0 = vector.load %arg1[%c0, %c0_0] : memref<64x16xf32, #tpu.memory_space<vmem>>, vector<64x16xf32>
    %1 = arith.truncf %0 : vector<64x16xf32> to vector<64x16xbf16>
    %c0_1 = arith.constant 0 : index
    %c0_2 = arith.constant 0 : index
    %2 = vector.load %arg2[%c0_1, %c0_2] : memref<16x32xbf16, #tpu.memory_space<vmem>>, vector<16x32xbf16>
    %cst = arith.constant dense<0.000000e+00> : vector<64x32xf32>
    %3 = tpu.matmul %1, %2, %cst {dimension_numbers = #tpu.dot_dimension_numbers<[1], [0], [0], [1], [0, 0, 1, 1], [], []>} : vector<64x16xbf16>, vector<16x32xbf16>, vector<64x32xf32> -> vector<64x32xf32>
    %c0_3 = arith.constant 0 : index
    %c0_4 = arith.constant 0 : index
    %4 = vector.load %arg3[%c0_3, %c0_4] : memref<1x32xf32, #tpu.memory_space<vmem>>, vector<1x32xf32>
    %5 = vector.broadcast %4 : vector<1x32xf32> to vector<64x32xf32>
    %6 = arith.addf %3, %5 : vector<64x32xf32>
    %7 = arith.truncf %6 : vector<64x32xf32> to vector<64x32xbf16>
    %c0_5 = arith.constant 0 : index
    %c0_6 = arith.constant 0 : index
    %8 = vector.load %arg4[%c0_5, %c0_6] : memref<64x32xbf16, #tpu.memory_space<vmem>>, vector<64x32xbf16>
    tpu.vector_store %arg4[%c0_5, %c0_6], %7 {strides = array<i32>} : memref<64x32xbf16, #tpu.memory_space<vmem>>, vector<64x32xbf16>,
    return
  }
  func.func @transform_0(%arg0: i32) -> (i32, i32) {
    %c0_i32 = arith.constant 0 : i32
    %c0_i32_0 = arith.constant 0 : i32
    return %arg0, %c0_i32 : i32, i32
  }
  func.func @transform_1(%arg0: i32) -> (i32, i32) {
    %c0_i32 = arith.constant 0 : i32
    %c0_i32_0 = arith.constant 0 : i32
    %c0_i32_1 = arith.constant 0 : i32
    return %c0_i32, %c0_i32_0 : i32, i32
  }
  func.func @transform_2(%arg0: i32) -> (i32, i32) {
    %c0_i32 = arith.constant 0 : i32
    %c0_i32_0 = arith.constant 0 : i32
    %c0_i32_1 = arith.constant 0 : i32
    return %c0_i32, %c0_i32_0 : i32, i32
  }
  func.func @transform_3(%arg0: i32) -> (i32, i32) {
    %c0_i32 = arith.constant 0 : i32
    %c0_i32_0 = arith.constant 0 : i32
    return %arg0, %c0_i32 : i32, i32
  }
}

</mosaic_0001>

<bundles_post_ra>
// kernel: tpu_custom_call.1
= control target key start
LH: loop header
LB: loop body
LE: loop exit
PB: predicated region body
PF: predicated region fallthrough
CT: control target
= control target key end

     0   :  { %s464_s12 = smov 0   ;;  %s495_s0 = inlined_call_operand.vmem [shape: f32[128,16], index: 0, kind: input, shape index: {}]   ;;  %s496_s1 = inlined_call_operand.vmem [shape: bf16[16,32], index: 1, kind: input, shape index: {}]   ;;  %s497_s2 = inlined_call_operand.vmem [shape: f32[1,32], index: 2, kind: input, shape index: {}]   ;;  %s498_s3 = inlined_call_operand.vmem [shape: bf16[128,32], index: 3, kind: output, shape index: {}]  }
   0x1 LB: > { %s377_s13 = sadd.s32 4294967295, %s442_s12   ;;  %p381_p0 = scmp.ge.s32.totalorder %s442_s12, 1  ;;  %s442_s12 = sphi %s464_s12, %s13_s12  }
   0x2   : > { %p138_p1 = scmp.lt.s32.totalorder %s442_s12, 3 }
   0x4   : > { %p139_p2 = pnand %p381_p0, %p138_p1 }
   0x5   : > { %s382_s16 = sshll.u32 (!%p139_p2), %s377_s13, 3 }
   0x6   : > { %142 = sbr.rel (%p139_p2) target bundleno = 223 (0xdf), region = 32  ;;  %p163_p3 = scmp.lt.s32.totalorder (!%p139_p2), %s382_s16, 15 }
   0xb   : > { %v435_v0 = vld [vmem:[%s496_s1] sm:$0xff]   ;;  %s500_s16 = smov (!%p163_p3, %s382_s16), 15  ;;  %vm202_vm0 = vcmask 130048   ;;  %vm312_vm1 = vcmask 257024  }
   0xc   : > { %415 = vmatprep.subr.bf16.mxu0 %v435_v0  ;;  %425 = vmatprep.subr.bf16.mxu1 %v435_v0  ;;  %s383_s17 = sshll.u32 %s500_s16, 3  ;;  %v386_v13 = vld [vmem:[%s497_s2] ss:$0 sm:$0xff]  ;;  %s385_s23 = sshll.u32 %s500_s16, 2 }
   0xd   : > { %416 = vmatpush3.bf16.msra.mxu0 %v435_v0  ;;  %426 = vmatpush3.bf16.msra.mxu1 %v435_v0  ;;  %s166_s20 = scalar_lea.vmem %s495_s0, %s383_s17  ;;  %s172_s26 = scalar_lea.vmem %s498_s3, %s385_s23 }
   0xe   : > { %v175_v1 = vld [vmem:[%s166_s20] sm:$0xff]  ;;  %v176_v2 = vld [vmem:[%s166_s20 + $0x8] sm:$0xff]  ;;  %v177_v6 = vld [vmem:[%s166_s20 + $0x10] sm:$0xff] }
   0xf   : > { %v179_v3 = vld [vmem:[%s166_s20 + $0x20] sm:$0xff]  ;;  %v183_v4 = vpack.c.bf16 %v176_v2, %v175_v1  ;;  %v180_v5 = vld [vmem:[%s166_s20 + $0x28] sm:$0xff]  ;;  %v178_v7 = vld [vmem:[%s166_s20 + $0x18] sm:$0xff] }
  0x10   : > { %v185_v8 = vpack.c.bf16 %v180_v5, %v179_v3  ;;  %v184_v9 = vpack.c.bf16 %v178_v7, %v177_v6  ;;  %v181_v10 = vld [vmem:[%s166_s20 + $0x30] sm:$0xff]  ;;  %v182_v11 = vld [vmem:[%s166_s20 + $0x38] sm:$0xff] }
  0x11   : > { %417 = vmatprep.mubr.msk.bf16.mxu0 %vm202_vm0, %v183_v4  ;;  %v186_v12 = vpack.c.bf16 %v182_v11, %v181_v10 }
  0x12   : > { %421 = vmatprep.mubr.msk.bf16.mxu1 %vm202_vm0, %v185_v8  ;;  %418 = vmatmul.mubr.msk.bf16.vlgmr.msra.gmra.mxu0 %vm202_vm0, %v184_v9 }
  0x13   : > { %422 = vmatmul.mubr.msk.bf16.vlgmr.msra.gmra.mxu1 %vm202_vm0, %v186_v12 }
  0xd2   : > { %v419_v14 = vpop.f32.mrf.mxu0 }
  0xd3   : > { %v258_v15 = vadd.f32 %v419_v14, %v386_v13  ;;  %v423_v16 = vpop.f32.mrf.mxu1 }
  0xd4   : > { %v274_v17 = vadd.f32 %v423_v16, %v386_v13  ;;  %v249_v18 = vpop.f32.mrf.mxu0 }
  0xd5   : > { %v404_v19 = vpack.c.bf16 %v258_v15, %v258_v15  ;;  %v250_v20 = vadd.f32 %v386_v13, %v249_v18  ;;  %v265_v21 = vpop.f32.mrf.mxu1 }
  0xd6   : > { %v408_v22 = vpack.c.bf16 %v274_v17, %v274_v17  ;;  %v266_v23 = vadd.f32 %v386_v13, %v265_v21  ;;  %v420_v24 = vpop.f32.mrf.mxu0 }
  0xd7   : > { %315 = vst.msk [vmem:[%s172_s26 + $0x8] sm:$0xf] %vm312_vm1, %v404_v19  ;;  %v402_v25 = vpack.c.bf16 %v250_v20, %v250_v20  ;;  %v261_v26 = vadd.f32 %v420_v24, %v386_v13  ;;  %v424_v27 = vpop.f32.mrf.mxu1 }
  0xd8   : > { %319 = vst.msk [vmem:[%s172_s26 + $0x18] sm:$0xf] %vm312_vm1, %v408_v22  ;;  %v406_v28 = vpack.c.bf16 %v266_v23, %v266_v23  ;;  %v277_v29 = vadd.f32 %v424_v27, %v386_v13  ;;  %v252_v30 = vpop.f32.mrf.mxu0 }
  0xd9   : > { %313 = vst.msk [vmem:[%s172_s26] sm:$0xf] %vm312_vm1, %v402_v25  ;;  %v405_v31 = vpack.c.bf16 %v261_v26, %v261_v26  ;;  %v253_v32 = vadd.f32 %v386_v13, %v252_v30  ;;  %v268_v33 = vpop.f32.mrf.mxu1 }
  0xda   : > { %317 = vst.msk [vmem:[%s172_s26 + $0x10] sm:$0xf] %vm312_vm1, %v406_v28  ;;  %v409_v34 = vpack.c.bf16 %v277_v29, %v277_v29  ;;  %v269_v35 = vadd.f32 %v386_v13, %v268_v33 }
  0xdb   : > { %316 = vst.msk [vmem:[%s172_s26 + $0xc] sm:$0xf] %vm312_vm1, %v405_v31  ;;  %v403_v36 = vpack.c.bf16 %v253_v32, %v253_v32 }
  0xdc   : > { %320 = vst.msk [vmem:[%s172_s26 + $0x1c] sm:$0xf] %vm312_vm1, %v409_v34  ;;  %v407_v37 = vpack.c.bf16 %v269_v35, %v269_v35 }
  0xdd   : > { %314 = vst.msk [vmem:[%s172_s26 + $0x4] sm:$0xf] %vm312_vm1, %v403_v36 }
  0xde   : > { %318 = vst.msk [vmem:[%s172_s26 + $0x14] sm:$0xf] %vm312_vm1, %v407_v37 }
  0xdf PF: > { %s13_s12 = sadd.s32 1, %s442_s12  }
  0xe0   : > { %p10_p4 = scmp.ge.s32.totalorder %s13_s12, 4  }
  0xe2   :  { %12 = sbr.rel (!%p10_p4) target bundleno = 1 (0x1), region = 62 }

</bundles_post_ra>
